<compile_context>
chip_gen: v7x
topology: tpu7x:2x2x1
jax: 0.10.0
libtpu: 0.0.40
codegen_flags: <defaults>
</compile_context>

<pallas_src>
import functools

import jax
import jax.numpy as jnp
from jax.experimental import pallas as pl
from jax.experimental.pallas import tpu as pltpu

EPS = 1e-5
LANE = 128


def _round_up(x, m):
    return ((x + m - 1) // m) * m


# ----------------------------------------------------------------------------
# Fused kernel: input_proj -> num_layers x (SAGE + BN + ReLU) -> mean pool ->
# fc1+BN+ReLU -> fc2+BN+ReLU -> fc3.   Single block, everything VMEM-resident.
# ----------------------------------------------------------------------------
def fused_forward_kernel(x_ref, adj_ref, pool_ref, w_in_ref, b_in_ref, *rest,
                         num_layers):
    out_ref = rest[-1]
    refs = rest[:-1]
    sage_refs = refs[:2 * num_layers]
    (w_fc1_ref, bss_fc1_ref, w_fc2_ref, bss_fc2_ref,
     w_fc3_ref, b_fc3_ref) = refs[2 * num_layers:]

    def mm(a, w_ref):
        # bf16 x bf16 MXU matmul with f32 accumulation.
        return jnp.dot(a.astype(jnp.bfloat16), w_ref[...],
                       preferred_element_type=jnp.float32)

    # x = relu(input_proj(x))        (no BatchNorm on this layer)
    h = jnp.maximum(mm(x_ref[...], w_in_ref) + b_in_ref[...], 0.0)

    adj = adj_ref[...]  # bf16, row-normalized: mean over incoming neighbors
    for i in range(num_layers):
        w_cat_ref = sage_refs[2 * i]          # (2*F_in, F_out) = [Wl ; Wr]
        bss = sage_refs[2 * i + 1][...]       # (3, F_out): bias, bn_scale, bn_shift
        aggr = jnp.dot(adj, h.astype(jnp.bfloat16),
                       preferred_element_type=jnp.float32)
        # Merged SAGEConv matmul: lin_l(aggr) + lin_r(x) == [aggr | x] @ [Wl; Wr]
        z = mm(jnp.concatenate([aggr, h], axis=-1), w_cat_ref)
        z = (z + bss[0:1, :]) * bss[1:2, :] + bss[2:3, :]   # +bias, folded BN
        h = jnp.maximum(z, 0.0)               # ReLU; dropout = identity (eval)

    # global_mean_pool: (G, N) @ (N, F)
    g = jnp.dot(pool_ref[...], h, preferred_element_type=jnp.float32)

    def fc_bn_relu(a, w_ref, bss_ref):
        bss = bss_ref[...]
        z = (mm(a, w_ref) + bss[0:1, :]) * bss[1:2, :] + bss[2:3, :]
        return jnp.maximum(z, 0.0)

    g = fc_bn_relu(g, w_fc1_ref, bss_fc1_ref)
    g = fc_bn_relu(g, w_fc2_ref, bss_fc2_ref)
    out_ref[...] = (mm(g, w_fc3_ref) + b_fc3_ref[...]).astype(out_ref.dtype)


# ----------------------------------------------------------------------------
# Parameter construction (deterministic, synthetic; eval-mode BN fold)
# ----------------------------------------------------------------------------
def init_params(key, in_channels, hidden, out_channels, num_layers):
    def linear(k, fan_in, fan_out):
        kw, kb = jax.random.split(k)
        lim = 1.0 / jnp.sqrt(jnp.float32(fan_in))
        w = jax.random.uniform(kw, (fan_in, fan_out), jnp.float32, -lim, lim)
        b = jax.random.uniform(kb, (fan_out,), jnp.float32, -lim, lim)
        return w, b

    def bn_fold(dim):
        # PyTorch init: gamma=1, beta=0, running_mean=0, running_var=1 (eval).
        gamma = jnp.ones((dim,), jnp.float32)
        beta = jnp.zeros((dim,), jnp.float32)
        mean = jnp.zeros((dim,), jnp.float32)
        var = jnp.ones((dim,), jnp.float32)
        scale = gamma / jnp.sqrt(var + EPS)
        shift = beta - mean * scale
        return scale, shift

    keys = jax.random.split(key, 4 + 2 * num_layers)
    p = {}
    p["in_w"], p["in_b"] = linear(keys[0], in_channels, hidden)

    p["sage"] = []
    for i in range(num_layers):
        d_in = hidden
        d_out = hidden if i < num_layers - 1 else out_channels
        wl, bl = linear(keys[1 + 2 * i], d_in, d_out)   # lin_l (with bias)
        wr, _ = linear(keys[2 + 2 * i], d_in, d_out)    # lin_r (no bias)
        scale, shift = bn_fold(d_out)
        p["sage"].append(dict(wl=wl, wr=wr, b=bl, scale=scale, shift=shift))

    p["fc1_w"], p["fc1_b"] = linear(keys[1 + 2 * num_layers], out_channels, hidden)
    p["fc1_scale"], p["fc1_shift"] = bn_fold(hidden)
    p["fc2_w"], p["fc2_b"] = linear(keys[2 + 2 * num_layers], hidden, hidden // 2)
    p["fc2_scale"], p["fc2_shift"] = bn_fold(hidden // 2)
    p["fc3_w"], p["fc3_b"] = linear(keys[3 + 2 * num_layers], hidden // 2, 1)
    return p


# ----------------------------------------------------------------------------
# Padding / packing of kernel operands (lane-dense, bf16 weights & adjacency)
# ----------------------------------------------------------------------------
def _pad2(a, rows, cols, dtype=None):
    a = jnp.pad(a, ((0, rows - a.shape[0]), (0, cols - a.shape[1])))
    return a if dtype is None else a.astype(dtype)


def _row(v, cols):
    return jnp.pad(v.reshape(1, -1), ((0, 0), (0, cols - v.shape[0])))


def _bss(b, scale, shift, cols):
    return jnp.concatenate([_row(b, cols), _row(scale, cols), _row(shift, cols)],
                           axis=0)


def pack_inputs(params, x, adj, pool_mat, num_layers):
    n = x.shape[0]
    g = pool_mat.shape[0]
    n_pad = _round_up(n, 16)                      # bf16 sublane packing for adj
    g_pad = _round_up(g, 8)
    f_in = _round_up(x.shape[1], LANE)
    hid = _round_up(params["in_w"].shape[1], LANE)

    args = [
        _pad2(x, n_pad, f_in),
        _pad2(adj, n_pad, n_pad, jnp.bfloat16),
        _pad2(pool_mat, g_pad, n_pad),
        _pad2(params["in_w"], f_in, hid, jnp.bfloat16),
        _row(params["in_b"], hid),
    ]
    for layer in params["sage"]:
        d_in = _round_up(layer["wl"].shape[0], LANE)
        d_out = _round_up(layer["wl"].shape[1], LANE)
        wl = _pad2(layer["wl"], d_in, d_out)
        wr = _pad2(layer["wr"], d_in, d_out)
        args.append(jnp.concatenate([wl, wr], axis=0).astype(jnp.bfloat16))
        args.append(_bss(layer["b"], layer["scale"], layer["shift"], d_out))

    out_c = _round_up(params["fc1_w"].shape[0], LANE)
    h1 = _round_up(params["fc1_w"].shape[1], LANE)
    h2 = _round_up(params["fc2_w"].shape[1], LANE)
    o1 = _round_up(params["fc3_w"].shape[1], LANE)    # final dim 1 -> 128 lanes

    args += [
        _pad2(params["fc1_w"], out_c, h1, jnp.bfloat16),
        _bss(params["fc1_b"], params["fc1_scale"], params["fc1_shift"], h1),
        _pad2(params["fc2_w"], h1, h2, jnp.bfloat16),
        _bss(params["fc2_b"], params["fc2_scale"], params["fc2_shift"], h2),
        _pad2(params["fc3_w"], h2, o1, jnp.bfloat16),
        _row(params["fc3_b"], o1),
    ]
    return args, g_pad, o1


# ----------------------------------------------------------------------------
# Graph glue (plain JAX): dense mean-aggregation adjacency + pooling matrix
# ----------------------------------------------------------------------------
def build_adj(edge_index, num_nodes):
    src, dst = edge_index[0], edge_index[1]
    adj = jnp.zeros((num_nodes, num_nodes), jnp.float32).at[dst, src].add(1.0)
    deg = adj.sum(axis=1, keepdims=True)
    return adj / jnp.where(deg > 0, deg, 1.0)      # mean over incoming neighbors


def build_pool(batch, num_graphs, num_nodes):
    pool = (batch[None, :] == jnp.arange(num_graphs)[:, None]).astype(jnp.float32)
    cnt = pool.sum(axis=1, keepdims=True)
    return pool / jnp.where(cnt > 0, cnt, 1.0)     # global mean pool


# ----------------------------------------------------------------------------
# Full forward: one fused pallas_call
# ----------------------------------------------------------------------------
def graphsage_forward(params, x, adj, pool_mat, *, num_layers, num_graphs):
    args, g_pad, out_lanes = pack_inputs(params, x, adj, pool_mat, num_layers)
    vmem = pl.BlockSpec(memory_space=pltpu.MemorySpace.VMEM)
    out = pl.pallas_call(
        functools.partial(fused_forward_kernel, num_layers=num_layers),
        out_shape=jax.ShapeDtypeStruct((g_pad, out_lanes), jnp.float32),
        in_specs=[vmem] * len(args),
        out_specs=vmem,
    )(*args)
    return out[:num_graphs, 0]                      # undo padding + squeeze(-1)


# ----------------------------------------------------------------------------
if __name__ == "__main__":
    key = jax.random.PRNGKey(0)
    k_param, k_x, k_e = jax.random.split(key, 3)

    in_channels, hidden, out_channels, num_layers = 16, 32, 32, 2
    num_nodes, num_graphs, num_edges = 16, 2, 40

    params = init_params(k_param, in_channels, hidden, out_channels, num_layers)

    x = jax.random.normal(k_x, (num_nodes, in_channels), jnp.float32)
    edge_index = jax.random.randint(k_e, (2, num_edges), 0, num_nodes, jnp.int32)
    batch = jnp.concatenate([jnp.zeros(8, jnp.int32), jnp.ones(8, jnp.int32)])

    adj = build_adj(edge_index, num_nodes)
    pool_mat = build_pool(batch, num_graphs, num_nodes)

    forward = jax.jit(functools.partial(graphsage_forward,
                                        num_layers=num_layers,
                                        num_graphs=num_graphs))
    out = forward(params, x, adj, pool_mat)
    out = jax.block_until_ready(out)
    assert out.shape == (num_graphs,)
    print("KERNEL_OK")
</pallas_src>

<mosaic_0001>
module attributes {stable_mosaic.version = 11 : i64} {
  func.func @fused_forward_kernel(%arg0: memref<16x128xf32, #tpu.memory_space<vmem>>, %arg1: memref<16x16xbf16, #tpu.memory_space<vmem>>, %arg2: memref<8x16xf32, #tpu.memory_space<vmem>>, %arg3: memref<128x128xbf16, #tpu.memory_space<vmem>>, %arg4: memref<1x128xf32, #tpu.memory_space<vmem>>, %arg5: memref<256x128xbf16, #tpu.memory_space<vmem>>, %arg6: memref<3x128xf32, #tpu.memory_space<vmem>>, %arg7: memref<256x128xbf16, #tpu.memory_space<vmem>>, %arg8: memref<3x128xf32, #tpu.memory_space<vmem>>, %arg9: memref<128x128xbf16, #tpu.memory_space<vmem>>, %arg10: memref<3x128xf32, #tpu.memory_space<vmem>>, %arg11: memref<128x128xbf16, #tpu.memory_space<vmem>>, %arg12: memref<3x128xf32, #tpu.memory_space<vmem>>, %arg13: memref<128x128xbf16, #tpu.memory_space<vmem>>, %arg14: memref<1x128xf32, #tpu.memory_space<vmem>>, %arg15: memref<8x128xf32, #tpu.memory_space<vmem>>) attributes {dimension_semantics = [], scalar_prefetch = 0 : i64, scratch_operands = 0 : i64, tpu.core_type = #tpu.core_type<tc>} {
    %c0 = arith.constant 0 : index
    %c0_0 = arith.constant 0 : index
    %0 = vector.load %arg0[%c0, %c0_0] : memref<16x128xf32, #tpu.memory_space<vmem>>, vector<16x128xf32>
    %1 = arith.truncf %0 : vector<16x128xf32> to vector<16x128xbf16>
    %c0_1 = arith.constant 0 : index
    %c0_2 = arith.constant 0 : index
    %2 = vector.load %arg3[%c0_1, %c0_2] : memref<128x128xbf16, #tpu.memory_space<vmem>>, vector<128x128xbf16>
    %cst = arith.constant dense<0.000000e+00> : vector<16x128xf32>
    %3 = tpu.matmul %1, %2, %cst {dimension_numbers = #tpu.dot_dimension_numbers<[1], [0], [0], [1], [0, 0, 1, 1], [], []>} : vector<16x128xbf16>, vector<128x128xbf16>, vector<16x128xf32> -> vector<16x128xf32>
    %c0_3 = arith.constant 0 : index
    %c0_4 = arith.constant 0 : index
    %4 = vector.load %arg4[%c0_3, %c0_4] : memref<1x128xf32, #tpu.memory_space<vmem>>, vector<1x128xf32>
    %5 = vector.broadcast %4 : vector<1x128xf32> to vector<16x128xf32>
    %6 = arith.addf %3, %5 : vector<16x128xf32>
    %cst_5 = arith.constant 0.000000e+00 : f32
    %7 = vector.broadcast %cst_5 : f32 to vector<16x128xf32>
    %8 = arith.maximumf %6, %7 : vector<16x128xf32>
    %c0_6 = arith.constant 0 : index
    %c0_7 = arith.constant 0 : index
    %9 = vector.load %arg1[%c0_6, %c0_7] : memref<16x16xbf16, #tpu.memory_space<vmem>>, vector<16x16xbf16>
    %c0_8 = arith.constant 0 : index
    %c0_9 = arith.constant 0 : index
    %10 = vector.load %arg6[%c0_8, %c0_9] : memref<3x128xf32, #tpu.memory_space<vmem>>, vector<3x128xf32>
    %11 = arith.truncf %8 : vector<16x128xf32> to vector<16x128xbf16>
    %cst_10 = arith.constant dense<0.000000e+00> : vector<16x128xf32>
    %12 = tpu.matmul %9, %11, %cst_10 {dimension_numbers = #tpu.dot_dimension_numbers<[1], [0], [0], [1], [0, 0, 1, 1], [], []>} : vector<16x16xbf16>, vector<16x128xbf16>, vector<16x128xf32> -> vector<16x128xf32>
    %13 = tpu.concatenate %12, %8 in 1 : vector<16x128xf32>, vector<16x128xf32> -> vector<16x256xf32>
    %14 = arith.truncf %13 : vector<16x256xf32> to vector<16x256xbf16>
    %c0_11 = arith.constant 0 : index
    %c0_12 = arith.constant 0 : index
    %15 = vector.load %arg5[%c0_11, %c0_12] : memref<256x128xbf16, #tpu.memory_space<vmem>>, vector<256x128xbf16>
    %cst_13 = arith.constant dense<0.000000e+00> : vector<16x128xf32>
    %16 = tpu.matmul %14, %15, %cst_13 {dimension_numbers = #tpu.dot_dimension_numbers<[1], [0], [0], [1], [0, 0, 1, 1], [], []>} : vector<16x256xbf16>, vector<256x128xbf16>, vector<16x128xf32> -> vector<16x128xf32>
    %17 = vector.extract_strided_slice %10 {offsets = [0, 0], sizes = [1, 128], strides = [1, 1]} : vector<3x128xf32> to vector<1x128xf32>
    %18 = vector.broadcast %17 : vector<1x128xf32> to vector<16x128xf32>
    %19 = arith.addf %16, %18 : vector<16x128xf32>
    %20 = vector.extract_strided_slice %10 {offsets = [1, 0], sizes = [1, 128], strides = [1, 1]} : vector<3x128xf32> to vector<1x128xf32>
    %21 = vector.broadcast %20 : vector<1x128xf32> to vector<16x128xf32>
    %22 = arith.mulf %19, %21 : vector<16x128xf32>
    %23 = vector.extract_strided_slice %10 {offsets = [2, 0], sizes = [1, 128], strides = [1, 1]} : vector<3x128xf32> to vector<1x128xf32>
    %24 = vector.broadcast %23 : vector<1x128xf32> to vector<16x128xf32>
    %25 = arith.addf %22, %24 : vector<16x128xf32>
    %cst_14 = arith.constant 0.000000e+00 : f32
    %26 = vector.broadcast %cst_14 : f32 to vector<16x128xf32>
    %27 = arith.maximumf %25, %26 : vector<16x128xf32>
    %c0_15 = arith.constant 0 : index
    %c0_16 = arith.constant 0 : index
    %28 = vector.load %arg8[%c0_15, %c0_16] : memref<3x128xf32, #tpu.memory_space<vmem>>, vector<3x128xf32>
    %29 = arith.truncf %27 : vector<16x128xf32> to vector<16x128xbf16>
    %cst_17 = arith.constant dense<0.000000e+00> : vector<16x128xf32>
    %30 = tpu.matmul %9, %29, %cst_17 {dimension_numbers = #tpu.dot_dimension_numbers<[1], [0], [0], [1], [0, 0, 1, 1], [], []>} : vector<16x16xbf16>, vector<16x128xbf16>, vector<16x128xf32> -> vector<16x128xf32>
    %31 = tpu.concatenate %30, %27 in 1 : vector<16x128xf32>, vector<16x128xf32> -> vector<16x256xf32>
    %32 = arith.truncf %31 : vector<16x256xf32> to vector<16x256xbf16>
    %c0_18 = arith.constant 0 : index
    %c0_19 = arith.constant 0 : index
    %33 = vector.load %arg7[%c0_18, %c0_19] : memref<256x128xbf16, #tpu.memory_space<vmem>>, vector<256x128xbf16>
    %cst_20 = arith.constant dense<0.000000e+00> : vector<16x128xf32>
    %34 = tpu.matmul %32, %33, %cst_20 {dimension_numbers = #tpu.dot_dimension_numbers<[1], [0], [0], [1], [0, 0, 1, 1], [], []>} : vector<16x256xbf16>, vector<256x128xbf16>, vector<16x128xf32> -> vector<16x128xf32>
    %35 = vector.extract_strided_slice %28 {offsets = [0, 0], sizes = [1, 128], strides = [1, 1]} : vector<3x128xf32> to vector<1x128xf32>
    %36 = vector.broadcast %35 : vector<1x128xf32> to vector<16x128xf32>
    %37 = arith.addf %34, %36 : vector<16x128xf32>
    %38 = vector.extract_strided_slice %28 {offsets = [1, 0], sizes = [1, 128], strides = [1, 1]} : vector<3x128xf32> to vector<1x128xf32>
    %39 = vector.broadcast %38 : vector<1x128xf32> to vector<16x128xf32>
    %40 = arith.mulf %37, %39 : vector<16x128xf32>
    %41 = vector.extract_strided_slice %28 {offsets = [2, 0], sizes = [1, 128], strides = [1, 1]} : vector<3x128xf32> to vector<1x128xf32>
    %42 = vector.broadcast %41 : vector<1x128xf32> to vector<16x128xf32>
    %43 = arith.addf %40, %42 : vector<16x128xf32>
    %cst_21 = arith.constant 0.000000e+00 : f32
    %44 = vector.broadcast %cst_21 : f32 to vector<16x128xf32>
    %45 = arith.maximumf %43, %44 : vector<16x128xf32>
    %c0_22 = arith.constant 0 : index
    %c0_23 = arith.constant 0 : index
    %46 = vector.load %arg2[%c0_22, %c0_23] : memref<8x16xf32, #tpu.memory_space<vmem>>, vector<8x16xf32>
    %cst_24 = arith.constant dense<0.000000e+00> : vector<8x128xf32>
    %47 = tpu.matmul %46, %45, %cst_24 {dimension_numbers = #tpu.dot_dimension_numbers<[1], [0], [0], [1], [0, 0, 1, 1], [], []>} : vector<8x16xf32>, vector<16x128xf32>, vector<8x128xf32> -> vector<8x128xf32>
    %c0_25 = arith.constant 0 : index
    %c0_26 = arith.constant 0 : index
    %48 = vector.load %arg10[%c0_25, %c0_26] : memref<3x128xf32, #tpu.memory_space<vmem>>, vector<3x128xf32>
    %49 = arith.truncf %47 : vector<8x128xf32> to vector<8x128xbf16>
    %c0_27 = arith.constant 0 : index
    %c0_28 = arith.constant 0 : index
    %50 = vector.load %arg9[%c0_27, %c0_28] : memref<128x128xbf16, #tpu.memory_space<vmem>>, vector<128x128xbf16>
    %cst_29 = arith.constant dense<0.000000e+00> : vector<8x128xf32>
    %51 = tpu.matmul %49, %50, %cst_29 {dimension_numbers = #tpu.dot_dimension_numbers<[1], [0], [0], [1], [0, 0, 1, 1], [], []>} : vector<8x128xbf16>, vector<128x128xbf16>, vector<8x128xf32> -> vector<8x128xf32>
    %52 = vector.extract_strided_slice %48 {offsets = [0, 0], sizes = [1, 128], strides = [1, 1]} : vector<3x128xf32> to vector<1x128xf32>
    %53 = vector.broadcast %52 : vector<1x128xf32> to vector<8x128xf32>
    %54 = arith.addf %51, %53 : vector<8x128xf32>
    %55 = vector.extract_strided_slice %48 {offsets = [1, 0], sizes = [1, 128], strides = [1, 1]} : vector<3x128xf32> to vector<1x128xf32>
    %56 = vector.broadcast %55 : vector<1x128xf32> to vector<8x128xf32>
    %57 = arith.mulf %54, %56 : vector<8x128xf32>
    %58 = vector.extract_strided_slice %48 {offsets = [2, 0], sizes = [1, 128], strides = [1, 1]} : vector<3x128xf32> to vector<1x128xf32>
    %59 = vector.broadcast %58 : vector<1x128xf32> to vector<8x128xf32>
    %60 = arith.addf %57, %59 : vector<8x128xf32>
    %cst_30 = arith.constant 0.000000e+00 : f32
    %61 = vector.broadcast %cst_30 : f32 to vector<8x128xf32>
    %62 = arith.maximumf %60, %61 : vector<8x128xf32>
    %c0_31 = arith.constant 0 : index
    %c0_32 = arith.constant 0 : index
    %63 = vector.load %arg12[%c0_31, %c0_32] : memref<3x128xf32, #tpu.memory_space<vmem>>, vector<3x128xf32>
    %64 = arith.truncf %62 : vector<8x128xf32> to vector<8x128xbf16>
    %c0_33 = arith.constant 0 : index
    %c0_34 = arith.constant 0 : index
    %65 = vector.load %arg11[%c0_33, %c0_34] : memref<128x128xbf16, #tpu.memory_space<vmem>>, vector<128x128xbf16>
    %cst_35 = arith.constant dense<0.000000e+00> : vector<8x128xf32>
    %66 = tpu.matmul %64, %65, %cst_35 {dimension_numbers = #tpu.dot_dimension_numbers<[1], [0], [0], [1], [0, 0, 1, 1], [], []>} : vector<8x128xbf16>, vector<128x128xbf16>, vector<8x128xf32> -> vector<8x128xf32>
    %67 = vector.extract_strided_slice %63 {offsets = [0, 0], sizes = [1, 128], strides = [1, 1]} : vector<3x128xf32> to vector<1x128xf32>
    %68 = vector.broadcast %67 : vector<1x128xf32> to vector<8x128xf32>
    %69 = arith.addf %66, %68 : vector<8x128xf32>
    %70 = vector.extract_strided_slice %63 {offsets = [1, 0], sizes = [1, 128], strides = [1, 1]} : vector<3x128xf32> to vector<1x128xf32>
    %71 = vector.broadcast %70 : vector<1x128xf32> to vector<8x128xf32>
    %72 = arith.mulf %69, %71 : vector<8x128xf32>
    %73 = vector.extract_strided_slice %63 {offsets = [2, 0], sizes = [1, 128], strides = [1, 1]} : vector<3x128xf32> to vector<1x128xf32>
    %74 = vector.broadcast %73 : vector<1x128xf32> to vector<8x128xf32>
    %75 = arith.addf %72, %74 : vector<8x128xf32>
    %cst_36 = arith.constant 0.000000e+00 : f32
    %76 = vector.broadcast %cst_36 : f32 to vector<8x128xf32>
    %77 = arith.maximumf %75, %76 : vector<8x128xf32>
    %78 = arith.truncf %77 : vector<8x128xf32> to vector<8x128xbf16>
    %c0_37 = arith.constant 0 : index
    %c0_38 = arith.constant 0 : index
    %79 = vector.load %arg13[%c0_37, %c0_38] : memref<128x128xbf16, #tpu.memory_space<vmem>>, vector<128x128xbf16>
    %cst_39 = arith.constant dense<0.000000e+00> : vector<8x128xf32>
    %80 = tpu.matmul %78, %79, %cst_39 {dimension_numbers = #tpu.dot_dimension_numbers<[1], [0], [0], [1], [0, 0, 1, 1], [], []>} : vector<8x128xbf16>, vector<128x128xbf16>, vector<8x128xf32> -> vector<8x128xf32>
    %c0_40 = arith.constant 0 : index
    %c0_41 = arith.constant 0 : index
    %81 = vector.load %arg14[%c0_40, %c0_41] : memref<1x128xf32, #tpu.memory_space<vmem>>, vector<1x128xf32>
    %82 = vector.broadcast %81 : vector<1x128xf32> to vector<8x128xf32>
    %83 = arith.addf %80, %82 : vector<8x128xf32>
    %c0_42 = arith.constant 0 : index
    %c0_43 = arith.constant 0 : index
    %84 = vector.load %arg15[%c0_42, %c0_43] : memref<8x128xf32, #tpu.memory_space<vmem>>, vector<8x128xf32>
    tpu.vector_store %arg15[%c0_42, %c0_43], %83 {strides = array<i32>} : memref<8x128xf32, #tpu.memory_space<vmem>>, vector<8x128xf32>,
    return
  }
}

</mosaic_0001>

<bundles_post_ra>
// kernel: graphsage_forward.1
= control target key start
LH: loop header
LB: loop body
LE: loop exit
PB: predicated region body
PF: predicated region fallthrough
CT: control target
= control target key end

     0   :  { %v1401_v0 = vmov 0.0   ;;  %vm1402_vm0 = vmmov 0   ;;  %vm177_vm1 = vcmask 130048   ;;  %v255_v44 = vlaneseq  ;;  %s1782_s3 = inlined_call_operand.vmem [shape: bf16[128,128], index: 3, kind: input, shape index: {}]   ;;  %s1783_s0 = inlined_call_operand.vmem [shape: f32[16,128], index: 0, kind: input, shape index: {}]   ;;  %s1784_s1 = inlined_call_operand.vmem [shape: bf16[16,16], index: 1, kind: input, shape index: {}]   ;;  %s1785_s5 = inlined_call_operand.vmem [shape: bf16[256,128], index: 5, kind: input, shape index: {}]   ;;  %s1786_s4 = inlined_call_operand.vmem [shape: f32[1,128], index: 4, kind: input, shape index: {}]   ;;  %s1787_s7 = inlined_call_operand.vmem [shape: bf16[256,128], index: 7, kind: input, shape index: {}]   ;;  %s1788_s6 = inlined_call_operand.vmem [shape: f32[3,128], index: 6, kind: input, shape index: {}]   ;;  %s1789_s9 = inlined_call_operand.vmem [shape: bf16[128,128], index: 9, kind: input, shape index: {}]   ;;  %s1790_s8 = inlined_call_operand.vmem [shape: f32[3,128], index: 8, kind: input, shape index: {}]   ;;  %s1791_s2 = inlined_call_operand.vmem [shape: f32[8,16], index: 2, kind: input, shape index: {}]   ;;  %s1792_s11 = inlined_call_operand.vmem [shape: bf16[128,128], index: 11, kind: input, shape index: {}]   ;;  %s1793_s13 = inlined_call_operand.vmem [shape: bf16[128,128], index: 13, kind: input, shape index: {}]   ;;  %s1794_s10 = inlined_call_operand.vmem [shape: f32[3,128], index: 10, kind: input, shape index: {}]   ;;  %s1795_s12 = inlined_call_operand.vmem [shape: f32[3,128], index: 12, kind: input, shape index: {}]   ;;  %s1796_s14 = inlined_call_operand.vmem [shape: f32[1,128], index: 14, kind: input, shape index: {}]   ;;  %s1797_s15 = inlined_call_operand.vmem [shape: f32[8,128], index: 15, kind: output, shape index: {}]  }
   0x1   :  { %1231 = vmatprep.subr.bf16.mxu0 %v1401_v0  ;;  %v1336_v1 = vld [vmem:[%s1782_s3] sm:$0xff]   ;;  %1247 = vmatprep.mubr.msk.bf16.mxu0 %vm1402_vm0, %v1401_v0  ;;  %v1337_v2 = vld [vmem:[%s1782_s3 + $0x8] sm:$0xff]   ;;  %v1338_v3 = vld [vmem:[%s1782_s3 + $0x10] sm:$0xff]  }
   0x2   :  { %1251 = vmatprep.subr.bf16.mxu1 %v1401_v0  ;;  %1253 = vmatprep.mubr.msk.bf16.mxu1 %vm1402_vm0, %v1401_v0  ;;  %v1339_v4 = vld [vmem:[%s1782_s3 + $0x18] sm:$0xff]   ;;  %v1340_v5 = vld [vmem:[%s1782_s3 + $0x20] sm:$0xff]   ;;  %v1341_v6 = vld [vmem:[%s1782_s3 + $0x28] sm:$0xff]   ;;  %v256_v45 = vshrl.u32 %v255_v44, 7 }
   0x3   :  { %1232 = vmatpush3.bf16.msra.mxu0 %v1336_v1  ;;  %v1342_v7 = vld [vmem:[%s1782_s3 + $0x30] sm:$0xff]   ;;  %v1343_v8 = vld [vmem:[%s1782_s3 + $0x38] sm:$0xff]   ;;  %v51_v9 = vld [vmem:[%s1783_s0] sm:$0xff] }
   0x4   :  { %1233 = vmatprep.subr.bf16.mxu0 %v1401_v0  ;;  %v52_v10 = vld [vmem:[%s1783_s0 + $0x8] sm:$0xff]  ;;  %v1074_v12 = vld [vmem:[%s1786_s4] ss:$0 sm:$0xff]  ;;  %v1349_v27 = vld [vmem:[%s1785_s5 + $0x50] sm:$0xff]   ;;  %v1590_v46 = vsub.s32 0, %v256_v45  ;;  %v1595_v48 = vsub.s32 1, %v256_v45 }
   0x5   :  { %v53_v11 = vpack.c.bf16 %v52_v10, %v51_v9  ;;  %v1345_v21 = vld [vmem:[%s1785_s5 + $0x40] sm:$0xff]   ;;  %v1347_v25 = vld [vmem:[%s1785_s5 + $0x48] sm:$0xff]   ;;  %v1350_v28 = vld [vmem:[%s1785_s5 + $0x10] sm:$0xff]   ;;  %v1598_v51 = vsub.s32 2, %v256_v45 }
   0x6   :  { %v1538_v23 = vld [vmem:[%s1784_s1] sm:$0xff]   ;;  %v1348_v26 = vld [vmem:[%s1785_s5 + $0x8] sm:$0xff]   ;;  %v1351_v29 = vld [vmem:[%s1785_s5 + $0x58] sm:$0xff]  }
   0x7   :  { %1234 = vmatpush3.bf16.msra.mxu0 %v1337_v2  ;;  %v1346_v24 = vld [vmem:[%s1785_s5] sm:$0xff]   ;;  %v1352_v30 = vld [vmem:[%s1785_s5 + $0x18] sm:$0xff]   ;;  %v1355_v33 = vld [vmem:[%s1785_s5 + $0x68] sm:$0xff]  }
   0x8   :  { %1235 = vmatprep.subr.bf16.mxu0 %v1401_v0  ;;  %v1353_v31 = vld [vmem:[%s1785_s5 + $0x60] sm:$0xff]   ;;  %v1356_v34 = vld [vmem:[%s1785_s5 + $0x28] sm:$0xff]   ;;  %v1357_v35 = vld [vmem:[%s1785_s5 + $0x70] sm:$0xff]  }
   0x9   :  { %v1354_v32 = vld [vmem:[%s1785_s5 + $0x20] sm:$0xff]   ;;  %v1358_v36 = vld [vmem:[%s1785_s5 + $0x30] sm:$0xff]   ;;  %v1359_v37 = vld [vmem:[%s1785_s5 + $0x78] sm:$0xff]  }
   0xa   :  { %v1360_v38 = vld [vmem:[%s1785_s5 + $0x38] sm:$0xff]   ;;  %v170_v47 = vld [vmem:[%s1788_s6] sm:$0x7]  ;;  %v1365_v9 = vld [vmem:[%s1787_s7 + $0x50] sm:$0xff]  }
   0xb   :  { %1236 = vmatpush3.bf16.msra.mxu0 %v1338_v3  ;;  %v258_v50 = vrot.slane %v170_v47, %v1590_v46  ;;  %v399_v54 = vrot.slane %v170_v47, %v1595_v48  ;;  %v405_v58 = vrot.slane %v170_v47, %v1598_v51  ;;  %v1366_v10 = vld [vmem:[%s1787_s7 + $0x10] sm:$0xff]   ;;  %v641_v47 = vld [vmem:[%s1791_s2] sm:$0xff] }
   0xc   :  { %1237 = vmatprep.subr.bf16.mxu0 %v1401_v0 }
   0xf   :  { %1238 = vmatpush3.bf16.msra.mxu0 %v1339_v4  ;;  %v1361_v4 = vld [vmem:[%s1787_s7 + $0x40] sm:$0xff]  }
  0x10   :  { %1239 = vmatprep.subr.bf16.mxu0 %v1401_v0 }
  0x13   :  { %1240 = vmatpush3.bf16.msra.mxu0 %v1340_v5 }
  0x14   :  { %1241 = vmatprep.subr.bf16.mxu0 %v1401_v0 }
  0x17   :  { %1242 = vmatpush3.bf16.msra.mxu0 %v1341_v6  ;;  %v1362_v6 = vld [vmem:[%s1787_s7] sm:$0xff]  }
  0x18   :  { %1243 = vmatprep.subr.bf16.mxu0 %v1401_v0 }
  0x1b   :  { %1244 = vmatpush3.bf16.msra.mxu0 %v1342_v7  ;;  %v1363_v7 = vld [vmem:[%s1787_s7 + $0x48] sm:$0xff]  }
  0x1c   :  { %1245 = vmatprep.subr.bf16.mxu0 %v1401_v0 }
  0x1f   :  { %1246 = vmatpush3.bf16.msra.mxu0 %v1343_v8  ;;  %v1364_v8 = vld [vmem:[%s1787_s7 + $0x8] sm:$0xff]  }
  0x22   :  { %1248 = vmatmul.mubr.bf16.vlgmr.msra.gmra.mrb[0].mxu0 %v53_v11  ;;  %v1367_v11 = vld [vmem:[%s1787_s7 + $0x58] sm:$0xff]  }
  0x23   :  { %1267 = vmatprep.mubr.msk.f32.mxu0 %vm1402_vm0, %v1401_v0 }
  0xf5   :  { %v159_v13 = vpop.f32.mrb[0].mxu0 }
  0xf6   :  { %v160_v14 = vadd.f32 %v1074_v12, %v159_v13  ;;  %v1249_v15 = vpop.f32.mrb[1].mxu0  ;;  %v1369_v13 = vld [vmem:[%s1787_s7 + $0x60] sm:$0xff]  }
  0xf7   :  { %v162_v16 = vpop.f32.mrb[2].mxu0  ;;  %v1371_v15 = vld [vmem:[%s1787_s7 + $0x68] sm:$0xff]  }
  0xf8   :  { %v163_v17 = vadd.f32 %v1074_v12, %v162_v16  ;;  %v1250_v18 = vpop.f32.mrb[3].mxu0  ;;  %v166_v19 = vmax.f32 %v160_v14, 0.0  ;;  %v1368_v12 = vld [vmem:[%s1787_s7 + $0x18] sm:$0xff]   ;;  %v1370_v14 = vld [vmem:[%s1787_s7 + $0x20] sm:$0xff]   ;;  %v1372_v16 = vld [vmem:[%s1787_s7 + $0x28] sm:$0xff]  }
  0xf9   :  { %v1374_v18 = vld [vmem:[%s1787_s7 + $0x30] sm:$0xff]  }
  0xfa   :  { %v167_v20 = vmax.f32 %v163_v17, 0.0  ;;  %v1373_v17 = vld [vmem:[%s1787_s7 + $0x70] sm:$0xff]  }
  0xfc   :  { %v171_v22 = vpack.c.bf16 %v167_v20, %v166_v19  ;;  %v1375_v19 = vld [vmem:[%s1787_s7 + $0x78] sm:$0xff]  }
  0xfd   :  { %v1376_v20 = vld [vmem:[%s1787_s7 + $0x38] sm:$0xff]  }
  0xfe   :  { %1252 = vmatpush3.bf16.msra.mxu1 %v171_v22 }
  0xff   :  { %1155 = vmatprep.subr.bf16.mxu1 %v1345_v21 }
 0x101   :  { %1254 = vmatmul.mubr.msk.bf16.vlgmr.msra.gmra.mrb[0].mxu1 %vm177_vm1, %v1538_v23 }
 0x102   :  { %387 = vmatprep.mubr.bf16.mxu1 %v171_v22  ;;  %1156 = vmatpush3.bf16.msra.mxu1 %v1346_v24 }
 0x103   :  { %1157 = vmatprep.subr.bf16.mxu1 %v1347_v25 }
 0x106   :  { %1158 = vmatpush3.bf16.msra.mxu1 %v1348_v26  ;;  %v1403_v26 = vmov 0.0|0.0  }
 0x107   :  { %1159 = vmatprep.subr.bf16.mxu1 %v1349_v27  ;;  %1330 = vmatprep.subr.bf16.mxu0 %v1403_v26  ;;  %v410_v27 = vld [vmem:[%s1790_s8] sm:$0x7]  ;;  %v1400_v26 = vld [vmem:[%s1793_s13 + $0x38] sm:$0xff]  }
 0x10a   :  { %1160 = vmatpush3.bf16.msra.mxu1 %v1350_v28 }
 0x10b   :  { %1161 = vmatprep.subr.bf16.mxu1 %v1351_v29  ;;  %v489_v29 = vrot.slane %v410_v27, %v1590_v46 }
 0x10e   :  { %1162 = vmatpush3.bf16.msra.mxu1 %v1352_v30 }
 0x10f   :  { %1163 = vmatprep.subr.bf16.mxu1 %v1353_v31 }
 0x112   :  { %1164 = vmatpush3.bf16.msra.mxu1 %v1354_v32  ;;  %v630_v32 = vrot.slane %v410_v27, %v1595_v48 }
 0x113   :  { %1165 = vmatprep.subr.bf16.mxu1 %v1355_v33 }
 0x116   :  { %1166 = vmatpush3.bf16.msra.mxu1 %v1356_v34 }
 0x117   :  { %1167 = vmatprep.subr.bf16.mxu1 %v1357_v35 }
 0x11a   :  { %1168 = vmatpush3.bf16.msra.mxu1 %v1358_v36  ;;  %v636_v36 = vrot.slane %v410_v27, %v1598_v51  ;;  %v836_v27 = vld [vmem:[%s1795_s12] sm:$0x7] }
 0x11b   :  { %1169 = vmatprep.subr.bf16.mxu1 %v1359_v37 }
 0x11e   :  { %1170 = vmatpush3.bf16.msra.mxu1 %v1360_v38 }
 0x11f   :  { %1257 = vmatprep.subr.bf16.mxu1 %v1401_v0 }
 0x1d4   :  { %v215_v39 = vpop.f32.mrb[0].mxu1 }
 0x1d5   :  { %v1255_v40 = vpop.f32.mrb[1].mxu1 }
 0x1d6   :  { %v218_v41 = vpop.f32.mrb[2].mxu1 }
 0x1d7   :  { %v222_v42 = vpack.c.bf16 %v218_v41, %v215_v39  ;;  %v1256_v43 = vpop.f32.mrb[3].mxu1 }
 0x1d9   :  { %388 = vmatmul.mubr.bf16.vlgmr.msra.gmra.mrb[4].mxu1 %v222_v42 }
 0x1da   :  { %1259 = vmatprep.mubr.msk.bf16.mxu1 %vm1402_vm0, %v1401_v0 }
 0x2ac   :  { %v1171_v49 = vpop.f32.mrb[4].mxu1 }
 0x2ad   :  { %v1172_v52 = vpop.f32.mrb[5].mxu1 }
 0x2ae   :  { %v1173_v53 = vadd.f32 %v1172_v52, %v1171_v49  ;;  %v1174_v55 = vpop.f32.mrb[6].mxu1  ;;  %v1377_v49 = vld [vmem:[%s1789_s9] sm:$0xff]   ;;  %v1379_v52 = vld [vmem:[%s1789_s9 + $0x10] sm:$0xff]  }
 0x2af   :  { %v1175_v56 = vpop.f32.mrb[7].mxu1 }
 0x2b0   :  { %v390_v57 = vadd.f32 %v1173_v53, %v258_v50  ;;  %v1176_v59 = vadd.f32 %v1175_v56, %v1174_v55  ;;  %v1380_v53 = vld [vmem:[%s1789_s9 + $0x18] sm:$0xff]   ;;  %v1382_v55 = vld [vmem:[%s1789_s9 + $0x28] sm:$0xff]   ;;  %v1383_v56 = vld [vmem:[%s1789_s9 + $0x30] sm:$0xff]  }
 0x2b2   :  { %v400_v60 = vmul.f32 %v399_v54, %v390_v57  ;;  %v393_v61 = vadd.f32 %v1176_v59, %v258_v50  ;;  %v1378_v50 = vld [vmem:[%s1789_s9 + $0x8] sm:$0xff]   ;;  %v1384_v57 = vld [vmem:[%s1789_s9 + $0x38] sm:$0xff]  }
 0x2b3   :  { %v1386_v59 = vld [vmem:[%s1792_s11 + $0x8] sm:$0xff]  }
 0x2b4   :  { %v406_v62 = vadd.f32 %v405_v58, %v400_v60  ;;  %v401_v63 = vmul.f32 %v399_v54, %v393_v61  ;;  %v1381_v54 = vld [vmem:[%s1789_s9 + $0x20] sm:$0xff]   ;;  %v1387_v60 = vld [vmem:[%s1792_s11 + $0x10] sm:$0xff]   ;;  %v1388_v61 = vld [vmem:[%s1792_s11 + $0x18] sm:$0xff]  }
 0x2b6   :  { %v407_v1 = vadd.f32 %v405_v58, %v401_v63  ;;  %v408_v2 = vmax.f32 %v406_v62, 0.0  ;;  %v1385_v58 = vld [vmem:[%s1792_s11] sm:$0xff]  }
 0x2b7   :  { %v1389_v62 = vld [vmem:[%s1792_s11 + $0x20] sm:$0xff]  }
 0x2b8   :  { %v409_v3 = vmax.f32 %v407_v1, 0.0 }
 0x2ba   :  { %v411_v5 = vpack.c.bf16 %v409_v3, %v408_v2  ;;  %v1390_v3 = vld [vmem:[%s1792_s11 + $0x28] sm:$0xff]  }
 0x2bc   :  { %1258 = vmatpush3.bf16.msra.mxu1 %v411_v5 }
 0x2bd   :  { %1179 = vmatprep.subr.bf16.mxu1 %v1361_v4  ;;  %v1391_v4 = vld [vmem:[%s1792_s11 + $0x30] sm:$0xff]  }
 0x2bf   :  { %1260 = vmatmul.mubr.msk.bf16.vlgmr.msra.gmra.mrb[8].mxu1 %vm177_vm1, %v1538_v23 }
 0x2c0   :  { %618 = vmatprep.mubr.bf16.mxu1 %v411_v5  ;;  %1180 = vmatpush3.bf16.msra.mxu1 %v1362_v6  ;;  %v1392_v5 = vld [vmem:[%s1792_s11 + $0x38] sm:$0xff]   ;;  %v1393_v6 = vld [vmem:[%s1793_s13] sm:$0xff]  }
 0x2c1   :  { %1181 = vmatprep.subr.bf16.mxu1 %v1363_v7  ;;  %v1394_v7 = vld [vmem:[%s1793_s13 + $0x8] sm:$0xff]  }
 0x2c4   :  { %1182 = vmatpush3.bf16.msra.mxu1 %v1364_v8  ;;  %v1395_v8 = vld [vmem:[%s1793_s13 + $0x10] sm:$0xff]  }
 0x2c5   :  { %1183 = vmatprep.subr.bf16.mxu1 %v1365_v9  ;;  %v1396_v9 = vld [vmem:[%s1793_s13 + $0x18] sm:$0xff]  }
 0x2c8   :  { %1184 = vmatpush3.bf16.msra.mxu1 %v1366_v10  ;;  %v1397_v10 = vld [vmem:[%s1793_s13 + $0x20] sm:$0xff]  }
 0x2c9   :  { %1185 = vmatprep.subr.bf16.mxu1 %v1367_v11  ;;  %v715_v11 = vld [vmem:[%s1794_s10] sm:$0x7] }
 0x2cc   :  { %1186 = vmatpush3.bf16.msra.mxu1 %v1368_v12  ;;  %v736_v12 = vrot.slane %v715_v11, %v1590_v46 }
 0x2cd   :  { %1187 = vmatprep.subr.bf16.mxu1 %v1369_v13  ;;  %v828_v13 = vrot.slane %v715_v11, %v1595_v48 }
 0x2d0   :  { %1188 = vmatpush3.bf16.msra.mxu1 %v1370_v14 }
 0x2d1   :  { %1189 = vmatprep.subr.bf16.mxu1 %v1371_v15 }
 0x2d4   :  { %1190 = vmatpush3.bf16.msra.mxu1 %v1372_v16  ;;  %v833_v16 = vrot.slane %v715_v11, %v1598_v51 }
 0x2d5   :  { %1191 = vmatprep.subr.bf16.mxu1 %v1373_v17 }
 0x2d8   :  { %1192 = vmatpush3.bf16.msra.mxu1 %v1374_v18 }
 0x2d9   :  { %1193 = vmatprep.subr.bf16.mxu1 %v1375_v19 }
 0x2dc   :  { %1194 = vmatpush3.bf16.msra.mxu1 %v1376_v20 }
 0x2dd   :  { %1290 = vmatprep.subr.bf16.mxu1 %v1401_v0 }
 0x392   :  { %v446_v21 = vpop.f32.mrb[8].mxu1 }
 0x393   :  { %v1261_v22 = vpop.f32.mrb[9].mxu1 }
 0x394   :  { %v449_v23 = vpop.f32.mrb[10].mxu1 }
 0x395   :  { %v453_v24 = vpack.c.bf16 %v449_v23, %v446_v21  ;;  %v1262_v25 = vpop.f32.mrb[11].mxu1 }
 0x396   :  { %v1399_v25 = vld [vmem:[%s1793_s13 + $0x30] sm:$0xff]  }
 0x397   :  { %619 = vmatmul.mubr.bf16.vlgmr.msra.gmra.mrb[12].mxu1 %v453_v24  ;;  %v1398_v24 = vld [vmem:[%s1793_s13 + $0x28] sm:$0xff]  }
 0x398   :  { %1306 = vmatprep.mubr.msk.bf16.mxu1 %vm1402_vm0, %v1401_v0  ;;  %1291 = vmatpush3.bf16.msra.mxu1 %v1385_v58 }
 0x399   :  { %1292 = vmatprep.subr.bf16.mxu1 %v1401_v0 }
 0x39c   :  { %1293 = vmatpush3.bf16.msra.mxu1 %v1386_v59 }
 0x39d   :  { %1294 = vmatprep.subr.bf16.mxu1 %v1401_v0 }
 0x3a0   :  { %1295 = vmatpush3.bf16.msra.mxu1 %v1387_v60 }
 0x3a1   :  { %1296 = vmatprep.subr.bf16.mxu1 %v1401_v0 }
 0x3a4   :  { %1297 = vmatpush3.bf16.msra.mxu1 %v1388_v61 }
 0x3a5   :  { %1298 = vmatprep.subr.bf16.mxu1 %v1401_v0 }
 0x3a8   :  { %1299 = vmatpush3.bf16.msra.mxu1 %v1389_v62 }
 0x3a9   :  { %1300 = vmatprep.subr.bf16.mxu1 %v1401_v0 }
 0x3ac   :  { %1301 = vmatpush3.bf16.msra.mxu1 %v1390_v3 }
 0x3ad   :  { %1302 = vmatprep.subr.bf16.mxu1 %v1401_v0 }
 0x3b0   :  { %1303 = vmatpush3.bf16.msra.mxu1 %v1391_v4 }
 0x3b1   :  { %1304 = vmatprep.subr.bf16.mxu1 %v1401_v0 }
 0x3b4   :  { %1305 = vmatpush3.bf16.msra.mxu1 %v1392_v5 }
 0x46a   :  { %v1195_v28 = vpop.f32.mrb[12].mxu1 }
 0x46b   :  { %v1196_v30 = vpop.f32.mrb[13].mxu1 }
 0x46c   :  { %v1197_v31 = vadd.f32 %v1196_v30, %v1195_v28  ;;  %v1198_v33 = vpop.f32.mrb[14].mxu1  ;;  %v857_v28 = vrot.slane %v836_v27, %v1590_v46 }
 0x46d   :  { %v1199_v34 = vpop.f32.mrb[15].mxu1 }
 0x46e   :  { %v621_v35 = vadd.f32 %v1197_v31, %v489_v29  ;;  %v1200_v37 = vadd.f32 %v1199_v34, %v1198_v33 }
 0x470   :  { %v631_v38 = vmul.f32 %v630_v32, %v621_v35  ;;  %v624_v39 = vadd.f32 %v1200_v37, %v489_v29  ;;  %v949_v29 = vrot.slane %v836_v27, %v1595_v48 }
 0x472   :  { %v637_v40 = vadd.f32 %v636_v36, %v631_v38  ;;  %v632_v41 = vmul.f32 %v630_v32, %v624_v39  ;;  %v954_v32 = vrot.slane %v836_v27, %v1598_v51  ;;  %v1135_v39 = vld [vmem:[%s1796_s14] ss:$0 sm:$0xff] }
 0x474   :  { %v638_v42 = vadd.f32 %v636_v36, %v632_v41  ;;  %v639_v43 = vmax.f32 %v637_v40, 0.0 }
 0x476   :  { %v640_v44 = vmax.f32 %v638_v42, 0.0 }
 0x478   :  { %v1331_v45 = vpack.c.bf16 %v640_v44, %v639_v43 }
 0x47a   :  { %1332 = vmatpush3.bf16.msra.mxu0 %v1331_v45 }
 0x47b   :  { %1270 = vmatprep.subr.bf16.mxu0 %v1401_v0 }
 0x47d   :  { %1268 = vmatmul.mubr.msk.f32.vlgmr.msra.gmra.mrb[4].mxu0 %vm177_vm1, %v641_v47 }
 0x47e   :  { %1271 = vmatpush3.bf16.msra.mxu0 %v1377_v49  ;;  %1286 = vmatprep.mubr.msk.bf16.mxu0 %vm1402_vm0, %v1401_v0 }
 0x47f   :  { %1272 = vmatprep.subr.bf16.mxu0 %v1401_v0 }
 0x482   :  { %1273 = vmatpush3.bf16.msra.mxu0 %v1378_v50 }
 0x483   :  { %1274 = vmatprep.subr.bf16.mxu0 %v1401_v0 }
 0x486   :  { %1275 = vmatpush3.bf16.msra.mxu0 %v1379_v52 }
 0x487   :  { %1276 = vmatprep.subr.bf16.mxu0 %v1401_v0 }
 0x48a   :  { %1277 = vmatpush3.bf16.msra.mxu0 %v1380_v53 }
 0x48b   :  { %1278 = vmatprep.subr.bf16.mxu0 %v1401_v0 }
 0x48e   :  { %1279 = vmatpush3.bf16.msra.mxu0 %v1381_v54 }
 0x48f   :  { %1280 = vmatprep.subr.bf16.mxu0 %v1401_v0 }
 0x492   :  { %1281 = vmatpush3.bf16.msra.mxu0 %v1382_v55 }
 0x493   :  { %1282 = vmatprep.subr.bf16.mxu0 %v1401_v0 }
 0x496   :  { %1283 = vmatpush3.bf16.msra.mxu0 %v1383_v56 }
 0x497   :  { %1284 = vmatprep.subr.bf16.mxu0 %v1401_v0 }
 0x49a   :  { %1285 = vmatpush3.bf16.msra.mxu0 %v1384_v57 }
 0x49b   :  { %1310 = vmatprep.subr.bf16.mxu0 %v1401_v0 }
 0x550   :  { %v711_v63 = vpop.f32.mrb[4].mxu0 }
 0x551   :  { %v716_v1 = vpack.c.bf16 %v711_v63, %v711_v63  ;;  %v1269_v2 = vpop.f32.mrb[5].mxu0 }
 0x553   :  { %1287 = vmatmul.mubr.bf16.vlgmr.msra.gmra.mrb[8].mxu0 %v716_v1 }
 0x554   :  { %1326 = vmatprep.mubr.msk.bf16.mxu0 %vm1402_vm0, %v1401_v0  ;;  %1311 = vmatpush3.bf16.msra.mxu0 %v1393_v6 }
 0x555   :  { %1312 = vmatprep.subr.bf16.mxu0 %v1401_v0 }
 0x558   :  { %1313 = vmatpush3.bf16.msra.mxu0 %v1394_v7 }
 0x559   :  { %1314 = vmatprep.subr.bf16.mxu0 %v1401_v0 }
 0x55c   :  { %1315 = vmatpush3.bf16.msra.mxu0 %v1395_v8 }
 0x55d   :  { %1316 = vmatprep.subr.bf16.mxu0 %v1401_v0 }
 0x560   :  { %1317 = vmatpush3.bf16.msra.mxu0 %v1396_v9 }
 0x561   :  { %1318 = vmatprep.subr.bf16.mxu0 %v1401_v0 }
 0x564   :  { %1319 = vmatpush3.bf16.msra.mxu0 %v1397_v10 }
 0x565   :  { %1320 = vmatprep.subr.bf16.mxu0 %v1401_v0 }
 0x568   :  { %1321 = vmatpush3.bf16.msra.mxu0 %v1398_v24 }
 0x569   :  { %1322 = vmatprep.subr.bf16.mxu0 %v1401_v0 }
 0x56c   :  { %1323 = vmatpush3.bf16.msra.mxu0 %v1399_v25 }
 0x56d   :  { %1324 = vmatprep.subr.bf16.mxu0 %v1401_v0 }
 0x570   :  { %1325 = vmatpush3.bf16.msra.mxu0 %v1400_v26 }
 0x626   :  { %v819_v14 = vpop.f32.mrb[8].mxu0 }
 0x627   :  { %v820_v15 = vadd.f32 %v819_v14, %v736_v12  ;;  %v1288_v17 = vpop.f32.mrb[9].mxu0 }
 0x628   :  { %v822_v18 = vpop.f32.mrb[10].mxu0 }
 0x629   :  { %v829_v19 = vmul.f32 %v828_v13, %v820_v15  ;;  %v1289_v20 = vpop.f32.mrb[11].mxu0 }
 0x62b   :  { %v834_v21 = vadd.f32 %v833_v16, %v829_v19 }
 0x62d   :  { %v835_v22 = vmax.f32 %v834_v21, 0.0 }
 0x62f   :  { %v837_v23 = vpack.c.bf16 %v835_v22, %v835_v22 }
 0x631   :  { %1307 = vmatmul.mubr.bf16.vlgmr.msra.gmra.mrb[16].mxu1 %v837_v23 }
 0x704   :  { %v940_v30 = vpop.f32.mrb[16].mxu1 }
 0x705   :  { %v941_v31 = vadd.f32 %v940_v30, %v857_v28  ;;  %v1308_v33 = vpop.f32.mrb[17].mxu1 }
 0x706   :  { %v943_v34 = vpop.f32.mrb[18].mxu1 }
 0x707   :  { %v950_v0 = vmul.f32 %v949_v29, %v941_v31  ;;  %v1309_v35 = vpop.f32.mrb[19].mxu1 }
 0x709   :  { %v955_v36 = vadd.f32 %v954_v32, %v950_v0 }
 0x70b   :  { %v956_v37 = vmax.f32 %v955_v36, 0.0 }
 0x70d   :  { %v957_v38 = vpack.c.bf16 %v956_v37, %v956_v37 }
 0x70f   :  { %1327 = vmatmul.mubr.bf16.vlgmr.msra.gmra.mrb[12].mxu0 %v957_v38 }
 0x7e2   :  { %v1063_v40 = vpop.f32.mrb[12].mxu0 }
 0x7e3   :  { %v1064_v46 = vadd.f32 %v1135_v39, %v1063_v40  ;;  %v1328_v41 = vpop.f32.mrb[13].mxu0 }
 0x7e4   :  { %v1066_v48 = vpop.f32.mrb[14].mxu0 }
 0x7e5   :  { %1069 = vst [vmem:[%s1797_s15] sm:$0xff] %v1064_v46  ;;  %v1329_v51 = vpop.f32.mrb[15].mxu0 }

</bundles_post_ra>
